<compile_context>
chip_gen: v7x
topology: tpu7x:2x2x1
jax: 0.10.0
libtpu: 0.0.40
codegen_flags: <defaults>
</compile_context>

<pallas_src>
import jax
import jax.numpy as jnp
from jax.experimental import pallas as pl
from jax.experimental.pallas import tpu as pltpu


def _round_up(x, m):
    return (x + m - 1) // m * m


# ----------------------------------------------------------------------------
# Kernel 1: row-wise L2 normalization (f32 math) -> bf16 output.
# Run once per forward call on the prototypes (grid-invariant work hoisted out
# of the batch loop of the main kernel).
# ----------------------------------------------------------------------------
def _l2_normalize_kernel(x_ref, o_ref):
    x = x_ref[...].astype(jnp.float32)
    ss = jnp.sum(x * x, axis=-1, keepdims=True)
    inv = jax.lax.rsqrt(jnp.maximum(ss, 1e-12))   # safe for all-zero pad rows
    o_ref[...] = (x * inv).astype(o_ref.dtype)


def l2_normalize_bf16(x):
    rows, d = x.shape
    if rows <= 512:
        rt = rows                                   # block == full extent
    else:
        # callers pad rows to a multiple of 128, so one of these divides
        rt = next(t for t in (512, 256, 128) if rows % t == 0)
    grid = (rows // rt,)
    return pl.pallas_call(
        _l2_normalize_kernel,
        out_shape=jax.ShapeDtypeStruct((rows, d), jnp.bfloat16),
        grid_spec=pltpu.PrefetchScalarGridSpec(
            num_scalar_prefetch=0,
            grid=grid,
            in_specs=[pl.BlockSpec((rt, d), lambda i: (i, 0))],
            out_specs=pl.BlockSpec((rt, d), lambda i: (i, 0)),
        ),
        compiler_params=pltpu.CompilerParams(
            dimension_semantics=("parallel",)),
    )(x)


# ----------------------------------------------------------------------------
# Kernel 2: fused feature-normalize (+ folded logit scale) + cosine-sim matmul.
# Grid: (batch tiles [parallel], class tiles [arbitrary]).
# ----------------------------------------------------------------------------
def _clip_logits_kernel(scale_ref, feat_ref, proto_ref, out_ref, fn_ref):
    # scale_ref : SMEM (1, 1) f32 -- exp(logit_scale), precomputed in wrapper
    # feat_ref  : VMEM (tb, D) f32 -- image features tile
    # proto_ref : VMEM (tc, D) bf16 -- pre-normalized prototype tile
    # out_ref   : VMEM (tb, tc) f32 -- logits tile
    # fn_ref    : VMEM (tb, D) bf16 scratch -- normalized+scaled features,
    #             computed once per batch tile, reused across class tiles.
    @pl.when(pl.program_id(1) == 0)
    def _():
        f = feat_ref[...].astype(jnp.float32)
        ss = jnp.sum(f * f, axis=-1, keepdims=True)
        inv = jax.lax.rsqrt(jnp.maximum(ss, 1e-12)) * scale_ref[0, 0]
        fn_ref[...] = (f * inv).astype(jnp.bfloat16)

    # Contract last dims of both operands (no materialized transpose),
    # bf16 operands, f32 accumulation on the MXU.
    out_ref[...] = jax.lax.dot_general(
        fn_ref[...], proto_ref[...],
        dimension_numbers=(((1,), (1,)), ((), ())),
        preferred_element_type=jnp.float32,
    ).astype(out_ref.dtype)


def clip_logits(features, prototypes, logit_scale, *, max_tb=512, max_tc=2048):
    """forward_lp: normalized cosine-similarity logits, computed in Pallas."""
    B, D = features.shape
    C, D2 = prototypes.shape
    assert D == D2

    # Batch tiling: pad rows to a sublane multiple of 8, tile up to max_tb.
    tb = min(_round_up(B, 8), max_tb)
    B_pad = _round_up(B, tb)

    # Class tiling: pad to a multiple of 128 (lane-dense stores, full MXU N);
    # tile over a second grid axis if the class count is very large (v7x VMEM).
    C_pad = _round_up(C, 128)
    if C_pad <= max_tc:
        tc = C_pad
    else:
        tc = max_tc
        C_pad = _round_up(C_pad, tc)

    feats = features.astype(jnp.float32)
    if B_pad != B:
        feats = jnp.pad(feats, ((0, B_pad - B), (0, 0)))
    protos = prototypes.astype(jnp.float32)
    if C_pad != C:
        protos = jnp.pad(protos, ((0, C_pad - C), (0, 0)))

    # Hoisted, grid-invariant prototype normalization (once per forward call).
    protos_n = l2_normalize_bf16(protos)

    # exp(logit_scale) precomputed once (no per-grid-step EUP exp).
    scale_arr = jnp.exp(jnp.asarray(logit_scale, jnp.float32)).reshape(1, 1)

    grid = (B_pad // tb, C_pad // tc)
    out = pl.pallas_call(
        _clip_logits_kernel,
        out_shape=jax.ShapeDtypeStruct((B_pad, C_pad), jnp.float32),
        grid_spec=pltpu.PrefetchScalarGridSpec(
            num_scalar_prefetch=0,
            grid=grid,
            in_specs=[
                pl.BlockSpec(memory_space=pltpu.MemorySpace.SMEM),   # exp(scale)
                pl.BlockSpec((tb, D), lambda i, j: (i, 0)),          # features
                pl.BlockSpec((tc, D), lambda i, j: (j, 0)),          # prototypes (bf16, normed)
            ],
            out_specs=pl.BlockSpec((tb, tc), lambda i, j: (i, j)),
            scratch_shapes=[pltpu.VMEM((tb, D), jnp.bfloat16)],
        ),
        compiler_params=pltpu.CompilerParams(
            dimension_semantics=("parallel", "arbitrary"),
            vmem_limit_bytes=64 * 1024 * 1024,
        ),
    )(scale_arr, feats, protos_n)

    return out[:B, :C]


# ----------------------------------------------------------------------------
# CustomCLIP-equivalent wrapper (glue in plain JAX).
# ----------------------------------------------------------------------------
class CustomCLIPPallas:
    """ZS-initialized adapter ('ZS' in cfg.TRAINER.ADAPTER.INIT) -> forward_lp."""

    def __init__(self, key, *, num_classes, embed_dim, in_chw):
        kw, kt = jax.random.split(key, 2)
        c, h, w = in_chw
        # TODO(synk): real CLIP visual backbone (ViT/ResNet) not reproducible
        # here; stand-in deterministic linear projection of the flattened image.
        self.w_visual = (jax.random.normal(kw, (c * h * w, embed_dim), jnp.float32)
                         / jnp.sqrt(c * h * w))
        # base_text_features would come from the frozen CLIP text encoder; here
        # they are deterministic synthetic embeddings of the same shape (C, D).
        self.base_text_features = jax.random.normal(
            kt, (num_classes, embed_dim), jnp.float32)
        # ZS init: prototypes = base_text_features.clone()
        self.prototypes = self.base_text_features
        # CLIP's logit_scale parameter init: log(1/0.07)
        self.logit_scale = jnp.log(jnp.float32(1.0 / 0.07))

    def image_encoder(self, image_nchw):
        # layout: NCHW input, flattened to (B, C*H*W), projected to (B, D).
        b = image_nchw.shape[0]
        flat = image_nchw.reshape(b, -1).astype(jnp.float32)
        return flat @ self.w_visual

    def __call__(self, image_nchw, return_features=False):
        image_features = self.image_encoder(image_nchw)
        logits = clip_logits(image_features, self.prototypes, self.logit_scale)
        if return_features:
            return logits, image_features
        return logits


# ----------------------------------------------------------------------------
# Reference (pure JAX, f32) for correctness check.
# ----------------------------------------------------------------------------
def _reference_forward_lp(features, prototypes, logit_scale):
    fn = features / jnp.linalg.norm(features, axis=-1, keepdims=True)
    pn = prototypes / jnp.linalg.norm(prototypes, axis=-1, keepdims=True)
    return fn @ pn.T * jnp.exp(logit_scale)


if __name__ == "__main__":
    key = jax.random.PRNGKey(0)

    # Case 1: tiny batch, class count well below the 128 lane padding.
    k_model, k_img, k2_model, k2_img = jax.random.split(key, 4)
    B, C_in, H, W = 4, 3, 16, 16
    num_classes, embed_dim = 16, 128

    model = CustomCLIPPallas(k_model, num_classes=num_classes,
                             embed_dim=embed_dim, in_chw=(C_in, H, W))
    image = jax.random.normal(k_img, (B, C_in, H, W), jnp.float32)

    logits, feats = model(image, return_features=True)
    logits = jax.block_until_ready(logits)

    ref = _reference_forward_lp(feats, model.prototypes, model.logit_scale)
    assert logits.shape == (B, num_classes)
    # bf16 MXU operands (f32 accumulation) -> loosened tolerance vs f32 ref.
    assert jnp.allclose(logits, ref, atol=5e-2, rtol=5e-2), "mismatch vs reference (case 1)"

    # Case 2: exercises batch padding (B=20 -> 24) and class padding (40 -> 128).
    B2, C2_in, H2, W2 = 20, 3, 8, 8
    num_classes2, embed_dim2 = 40, 256
    model2 = CustomCLIPPallas(k2_model, num_classes=num_classes2,
                              embed_dim=embed_dim2, in_chw=(C2_in, H2, W2))
    image2 = jax.random.normal(k2_img, (B2, C2_in, H2, W2), jnp.float32)

    logits2, feats2 = model2(image2, return_features=True)
    logits2 = jax.block_until_ready(logits2)
    ref2 = _reference_forward_lp(feats2, model2.prototypes, model2.logit_scale)
    assert logits2.shape == (B2, num_classes2)
    assert jnp.allclose(logits2, ref2, atol=5e-2, rtol=5e-2), "mismatch vs reference (case 2)"

    print("KERNEL_OK")
</pallas_src>

<mosaic_0001>
module attributes {stable_mosaic.version = 11 : i64} {
  func.func @_l2_normalize_kernel(%arg0: i32, %arg1: memref<128x128xf32, #tpu.memory_space<vmem>>, %arg2: memref<128x128xbf16, #tpu.memory_space<vmem>>) attributes {dimension_semantics = [#tpu.dimension_semantics<parallel>], iteration_bounds = array<i64: 1>, scalar_prefetch = 0 : i64, scratch_operands = 0 : i64, tpu.core_type = #tpu.core_type<tc>, window_params = [{transform_indices = @transform_0, window_bounds = array<i64: 128, 128>}, {transform_indices = @transform_1, window_bounds = array<i64: 128, 128>}]} {
    %c0 = arith.constant 0 : index
    %c0_0 = arith.constant 0 : index
    %0 = vector.load %arg1[%c0, %c0_0] : memref<128x128xf32, #tpu.memory_space<vmem>>, vector<128x128xf32>
    %1 = arith.mulf %0, %0 : vector<128x128xf32>
    %cst = arith.constant dense<0.000000e+00> : vector<128xf32>
    %2 = vector.multi_reduction <add>, %1, %cst [1] : vector<128x128xf32> to vector<128xf32>
    %3 = vector.shape_cast %2 : vector<128xf32> to vector<128x1xf32>
    %cst_1 = arith.constant 9.99999996E-13 : f32
    %4 = vector.broadcast %cst_1 : f32 to vector<128x1xf32>
    %5 = arith.maximumf %3, %4 : vector<128x1xf32>
    %6 = math.rsqrt %5 : vector<128x1xf32>
    %7 = vector.broadcast %6 : vector<128x1xf32> to vector<128x128xf32>
    %8 = arith.mulf %0, %7 : vector<128x128xf32>
    %9 = arith.truncf %8 : vector<128x128xf32> to vector<128x128xbf16>
    %c0_2 = arith.constant 0 : index
    %c0_3 = arith.constant 0 : index
    %10 = vector.load %arg2[%c0_2, %c0_3] : memref<128x128xbf16, #tpu.memory_space<vmem>>, vector<128x128xbf16>
    tpu.vector_store %arg2[%c0_2, %c0_3], %9 {strides = array<i32>} : memref<128x128xbf16, #tpu.memory_space<vmem>>, vector<128x128xbf16>,
    return
  }
  func.func @transform_0(%arg0: i32) -> (i32, i32) {
    %c0_i32 = arith.constant 0 : i32
    %c0_i32_0 = arith.constant 0 : i32
    return %arg0, %c0_i32 : i32, i32
  }
  func.func @transform_1(%arg0: i32) -> (i32, i32) {
    %c0_i32 = arith.constant 0 : i32
    %c0_i32_0 = arith.constant 0 : i32
    return %arg0, %c0_i32 : i32, i32
  }
}

</mosaic_0001>

<bundles_post_ra>
// kernel: tpu_custom_call.1
= control target key start
LH: loop header
LB: loop body
LE: loop exit
PB: predicated region body
PF: predicated region fallthrough
CT: control target
= control target key end

     0   :  { %6 = vsyncpa [#allocation3], 0  ;;  %s517_s0 = inlined_call_operand.hbm [shape: f32[128,128], index: 0, kind: input, shape index: {}]   ;;  %s518_s1 = inlined_call_operand.hbm [shape: bf16[128,128], index: 1, kind: output, shape index: {}]  }
   0x1   :  { %7 = vsyncpa [#allocation4], 0  ;;  %s397_s6 = smov [#allocation2]   ;;  %s349_s10 = scalar_lea.hbm %s517_s0, 2048 }
   0x2   :  { %s13_s7 = sshll.u32 %s397_s6, 4  ;;  %p350_p0 = scmp.ne.s32.totalorder %s517_s0, %s349_s10  ;;  %s14_s7 = int_to_ptr.vmem [resolvable:$true] %s13_s7 }
   0x3   :  { %p353_p1 = scmp.lt.u32.totalorder %s349_s10, %s517_s0 }
   0x5   :  { %p355_p2 = pnand %p353_p1, %p350_p0 }
   0x7   :  { %358 = shalt.err (!%p355_p2)
}
   0x8   :  { %s359_s15 = scalar_lea.vmem %s14_s7, 2048  ;;  %p364_p4 = scmp.lt.s32.totalorder %s14_s7, %s14_s7 }
   0x9   :  { %p360_p3 = scmp.ne.s32.totalorder %s14_s7, %s359_s15  ;;  %p365_p5 = scmp.lt.s32.totalorder %s359_s15, %s359_s15 }
   0xb   :  { %p366_p6 = por %p365_p5, %p364_p4 }
   0xd   :  { %p367_p7 = pnand %p366_p6, %p360_p3 }
   0xf   :  { %370 = shalt.err (!%p367_p7)
}
  0x10   :  { %s398_s16 = smov 128   ;;  %s399_s17 = smov 8  }
  0x11   :  { %19 = dma.hbm_to_vmem [thread:$0]  %s517_s0, 2048, %s14_s7, [#allocation3], %s398_s16, %s398_s16, %s399_s17  }
  0x12   :  { %393 = dma.done.wait [#allocation3], 2048  }
  0x13   :  { %394 = vsyncadd [#allocation3], 4294965248  ;;  %v425_v0 = vld [vmem:[#allocation2 + $0x10] sm:$0xff]  ;;  %v427_v1 = vld [vmem:[#allocation2] sm:$0xff]  ;;  %s400_s0 = smov [#allocation5]  }
  0x14   :  { %v429_v2 = vld [vmem:[#allocation2 + $0x18] sm:$0xff]  ;;  %v41_v3 = vmul.f32 %v425_v0, %v425_v0  ;;  %v39_v4 = vmul.f32 %v427_v1, %v427_v1  ;;  %v435_v5 = vld [vmem:[#allocation2 + $0x8] sm:$0xff]  ;;  %v443_v9 = vld [vmem:[#allocation2 + $0x20] sm:$0xff]  ;;  %s220_s20 = sshll.u32 %s400_s0, 4  ;;  %s221_s20 = int_to_ptr.vmem [resolvable:$true] %s220_s20 }
  0x15   :  { %v42_v6 = vmul.f32 %v429_v2, %v429_v2  ;;  %v40_v7 = vmul.f32 %v435_v5, %v435_v5  ;;  %v441_v8 = vld [vmem:[#allocation2 + $0x28] sm:$0xff]  ;;  %v43_v11 = vmul.f32 %v443_v9, %v443_v9  ;;  %v449_v12 = vld [vmem:[#allocation2 + $0x38] sm:$0xff]  ;;  %v451_v13 = vld [vmem:[#allocation2 + $0x30] sm:$0xff]  ;;  %s371_s21 = scalar_lea.vmem %s221_s20, 1024  ;;  %p376_p9 = scmp.lt.s32.totalorder %s221_s20, %s221_s20 }
  0x16   :  { %59 = vadd.xlane.f32.xlu1 %v41_v3  ;;  %55 = vadd.xlane.f32.xlu0 %v39_v4  ;;  %v44_v10 = vmul.f32 %v441_v8, %v441_v8  ;;  %v46_v14 = vmul.f32 %v449_v12, %v449_v12  ;;  %v45_v15 = vmul.f32 %v451_v13, %v451_v13  ;;  %v457_v16 = vld [vmem:[#allocation2 + $0x48] sm:$0xff]  ;;  %v459_v17 = vld [vmem:[#allocation2 + $0x40] sm:$0xff]  ;;  %v465_v20 = vld [vmem:[#allocation2 + $0x58] sm:$0xff]  ;;  %p372_p8 = scmp.ne.s32.totalorder %s221_s20, %s371_s21  ;;  %p377_p10 = scmp.lt.s32.totalorder %s371_s21, %s371_s21 }
  0x17   :  { %v48_v18 = vmul.f32 %v457_v16, %v457_v16  ;;  %v47_v19 = vmul.f32 %v459_v17, %v459_v17  ;;  %v467_v21 = vld [vmem:[#allocation2 + $0x50] sm:$0xff]  ;;  %v50_v22 = vmul.f32 %v465_v20, %v465_v20  ;;  %v473_v24 = vld [vmem:[#allocation2 + $0x68] sm:$0xff]  ;;  %v475_v25 = vld [vmem:[#allocation2 + $0x60] sm:$0xff] }
  0x18   :  { %v49_v23 = vmul.f32 %v467_v21, %v467_v21  ;;  %v52_v26 = vmul.f32 %v473_v24, %v473_v24  ;;  %v51_v27 = vmul.f32 %v475_v25, %v475_v25  ;;  %v481_v28 = vld [vmem:[#allocation2 + $0x78] sm:$0xff]  ;;  %v483_v29 = vld [vmem:[#allocation2 + $0x70] sm:$0xff]  ;;  %p378_p11 = por %p377_p10, %p376_p9 }
  0x19   :  { %v54_v30 = vmul.f32 %v481_v28, %v481_v28  ;;  %v53_v31 = vmul.f32 %v483_v29, %v483_v29 }
  0x1a   :  { %61 = vadd.xlane.f32.xlu1 %v42_v6  ;;  %57 = vadd.xlane.f32.xlu0 %v40_v7  ;;  %p379_p12 = pnand %p378_p11, %p372_p8 }
  0x1e   :  { %65 = vadd.xlane.f32.xlu1 %v44_v10  ;;  %63 = vadd.xlane.f32.xlu0 %v43_v11 }
  0x22   :  { %69 = vadd.xlane.f32.xlu1 %v46_v14  ;;  %67 = vadd.xlane.f32.xlu0 %v45_v15 }
  0x26   :  { %73 = vadd.xlane.f32.xlu1 %v48_v18  ;;  %71 = vadd.xlane.f32.xlu0 %v47_v19 }
  0x2a   :  { %77 = vadd.xlane.f32.xlu1 %v50_v22  ;;  %75 = vadd.xlane.f32.xlu0 %v49_v23 }
  0x2e   :  { %81 = vadd.xlane.f32.xlu1 %v52_v26  ;;  %79 = vadd.xlane.f32.xlu0 %v51_v27 }
  0x32   :  { %85 = vadd.xlane.f32.xlu1 %v54_v30  ;;  %83 = vadd.xlane.f32.xlu0 %v53_v31 }
  0xa3   :  { %v60_v32 = vpop.xlane.xlu1 %59  ;;  %v56_v33 = vpop.xlane.xlu0 %55 }
  0xa4   :  { %v89_v34 = vmax.f32 %v60_v32, 1e-12  ;;  %v87_v35 = vmax.f32 %v56_v33, 1e-12 }
  0xa6   :  { %317 = vrsqrt.f32 %v89_v34 }
  0xa7   :  { %v62_v36 = vpop.xlane.xlu1 %61  ;;  %v58_v37 = vpop.xlane.xlu0 %57  ;;  %319 = vrsqrt.f32 %v87_v35 }
  0xa8   :  { %v90_v38 = vmax.f32 %v62_v36, 1e-12  ;;  %v88_v39 = vmax.f32 %v58_v37, 1e-12 }
  0xaa   :  { %321 = vrsqrt.f32 %v90_v38 }
  0xab   :  { %323 = vrsqrt.f32 %v88_v39  ;;  %v66_v40 = vpop.xlane.xlu1 %65  ;;  %v64_v41 = vpop.xlane.xlu0 %63 }
  0xac   :  { %v92_v42 = vmax.f32 %v66_v40, 1e-12  ;;  %v91_v43 = vmax.f32 %v64_v41, 1e-12 }
  0xae   :  { %325 = vrsqrt.f32 %v92_v42 }
  0xaf   :  { %327 = vrsqrt.f32 %v91_v43  ;;  %v70_v44 = vpop.xlane.xlu1 %69  ;;  %v68_v45 = vpop.xlane.xlu0 %67 }
  0xb0   :  { %v94_v46 = vmax.f32 %v70_v44, 1e-12  ;;  %v93_v47 = vmax.f32 %v68_v45, 1e-12  ;;  %v318_v48 = vpop.eup %317 }
  0xb1   :  { %v320_v49 = vpop.eup %319  ;;  %v121_v56 = vmul.f32 %v318_v48, %v425_v0 }
  0xb2   :  { %329 = vrsqrt.f32 %v94_v46  ;;  %v119_v58 = vmul.f32 %v320_v49, %v427_v1 }
  0xb3   :  { %331 = vrsqrt.f32 %v93_v47  ;;  %v74_v50 = vpop.xlane.xlu1 %73  ;;  %v72_v51 = vpop.xlane.xlu0 %71 }
  0xb4   :  { %v322_v52 = vpop.eup %321  ;;  %v96_v53 = vmax.f32 %v74_v50, 1e-12  ;;  %v95_v54 = vmax.f32 %v72_v51, 1e-12 }
  0xb5   :  { %v324_v55 = vpop.eup %323  ;;  %v122_v57 = vmul.f32 %v322_v52, %v429_v2 }
  0xb6   :  { %v120_v59 = vmul.f32 %v324_v55, %v435_v5  ;;  %333 = vrsqrt.f32 %v96_v53 }
  0xb7   :  { %v272_v60 = vpack.c.bf16 %v122_v57, %v121_v56  ;;  %335 = vrsqrt.f32 %v95_v54  ;;  %v78_v61 = vpop.xlane.xlu1 %77  ;;  %v76_v62 = vpop.xlane.xlu0 %75 }
  0xb8   :  { %v326_v63 = vpop.eup %325  ;;  %v267_v3 = vpack.c.bf16 %v120_v59, %v119_v58  ;;  %v98_v4 = vmax.f32 %v78_v61, 1e-12  ;;  %v97_v6 = vmax.f32 %v76_v62, 1e-12 }
  0xb9   :  { %v328_v7 = vpop.eup %327  ;;  %304 = vst [vmem:[#allocation5 + $0x8] sm:$0xff] %v272_v60   ;;  %v124_v10 = vmul.f32 %v326_v63, %v441_v8 }
  0xba   :  { %268 = vst [vmem:[#allocation5] sm:$0xff] %v267_v3   ;;  %v123_v0 = vmul.f32 %v328_v7, %v443_v9  ;;  %337 = vrsqrt.f32 %v98_v4 }
  0xbb   :  { %339 = vrsqrt.f32 %v97_v6  ;;  %v82_v1 = vpop.xlane.xlu1 %81  ;;  %v80_v2 = vpop.xlane.xlu0 %79 }
  0xbc   :  { %v330_v5 = vpop.eup %329  ;;  %v277_v11 = vpack.c.bf16 %v124_v10, %v123_v0  ;;  %v100_v14 = vmax.f32 %v82_v1, 1e-12  ;;  %v99_v15 = vmax.f32 %v80_v2, 1e-12 }
  0xbd   :  { %v332_v18 = vpop.eup %331  ;;  %v126_v19 = vmul.f32 %v330_v5, %v449_v12 }
  0xbe   :  { %305 = vst [vmem:[#allocation5 + $0x10] sm:$0xff] %v277_v11   ;;  %v125_v22 = vmul.f32 %v332_v18, %v451_v13  ;;  %341 = vrsqrt.f32 %v100_v14 }
  0xbf   :  { %343 = vrsqrt.f32 %v99_v15  ;;  %v86_v8 = vpop.xlane.xlu1 %85  ;;  %v84_v23 = vpop.xlane.xlu0 %83 }
  0xc0   :  { %v334_v26 = vpop.eup %333  ;;  %v282_v9 = vpack.c.bf16 %v126_v19, %v125_v22  ;;  %v102_v27 = vmax.f32 %v86_v8, 1e-12  ;;  %v101_v30 = vmax.f32 %v84_v23, 1e-12 }
  0xc1   :  { %v336_v31 = vpop.eup %335  ;;  %v128_v32 = vmul.f32 %v334_v26, %v457_v16 }
  0xc2   :  { %306 = vst [vmem:[#allocation5 + $0x18] sm:$0xff] %v282_v9   ;;  %v127_v33 = vmul.f32 %v336_v31, %v459_v17  ;;  %345 = vrsqrt.f32 %v102_v27 }
  0xc3   :  { %347 = vrsqrt.f32 %v101_v30 }
  0xc4   :  { %v338_v12 = vpop.eup %337  ;;  %v287_v34 = vpack.c.bf16 %v128_v32, %v127_v33 }
  0xc5   :  { %v340_v35 = vpop.eup %339  ;;  %v130_v13 = vmul.f32 %v338_v12, %v465_v20 }
  0xc6   :  { %307 = vst [vmem:[#allocation5 + $0x20] sm:$0xff] %v287_v34   ;;  %v129_v36 = vmul.f32 %v340_v35, %v467_v21 }
  0xc8   :  { %v342_v37 = vpop.eup %341  ;;  %v292_v38 = vpack.c.bf16 %v130_v13, %v129_v36 }
  0xc9   :  { %v344_v39 = vpop.eup %343  ;;  %v132_v40 = vmul.f32 %v342_v37, %v473_v24 }
  0xca   :  { %308 = vst [vmem:[#allocation5 + $0x28] sm:$0xff] %v292_v38   ;;  %v131_v16 = vmul.f32 %v344_v39, %v475_v25 }
  0xcc   :  { %v346_v41 = vpop.eup %345  ;;  %v297_v17 = vpack.c.bf16 %v132_v40, %v131_v16 }
  0xcd   :  { %v348_v42 = vpop.eup %347  ;;  %v134_v43 = vmul.f32 %v346_v41, %v481_v28 }
  0xce   :  { %309 = vst [vmem:[#allocation5 + $0x30] sm:$0xff] %v297_v17   ;;  %v133_v20 = vmul.f32 %v348_v42, %v483_v29 }
  0xd0   :  { %v302_v21 = vpack.c.bf16 %v134_v43, %v133_v20 }
  0xd2   :  { %310 = vst [vmem:[#allocation5 + $0x38] sm:$0xff] %v302_v21  }
  0xd3   :  { %382 = shalt.err (!%p379_p12)
}
  0xd4   :  { %s383_s24 = scalar_lea.hbm %s518_s1, 1024 }
  0xd5   :  { %p384_p13 = scmp.ne.s32.totalorder %s518_s1, %s383_s24  ;;  %p387_p0 = scmp.lt.u32.totalorder %s383_s24, %s518_s1 }
  0xd7   :  { %p389_p1 = pnand %p387_p0, %p384_p13 }
  0xd9   :  { %392 = shalt.err (!%p389_p1)
}
  0xda   :  { %s401_s29 = smov 64   ;;  %s402_s30 = smov 4  }
  0xdb   :  { %226 = dma.vmem_to_hbm [thread:$0]  %s221_s20, 1024, %s518_s1, [#allocation4], %s401_s29, %s401_s29, %s402_s30  }
  0xdc   :  { %395 = dma.done.wait [#allocation4], 1024  }
  0xdd   :  { %396 = vsyncadd [#allocation4], 4294966272 }
  0xde   :  { %230 = vsyncpa [#allocation3], 1 }
  0xdf   :  { %231 = vsyncpa [#allocation4], 1 }

</bundles_post_ra>
